<compile_context>
chip_gen: v6e
topology: v6e:2x2x1
jax: 0.10.0
libtpu: 0.0.40
codegen_flags: <defaults>
</compile_context>

<pallas_src>
import jax
import jax.numpy as jnp
from jax.experimental import pallas as pl
from jax.experimental.pallas import tpu as pltpu


def _round_up(x, m):
    return (x + m - 1) // m * m


def encoder_kernel(ids_ref, wfused_ref, whh_ref, wlin_ref, blin_ref,
                   scores_ref, gx_sc):
    """Whole Encoder forward in one kernel invocation.

    ids_ref   : (T*B, 1) int32   flattened time-major token ids (B padded to 8)
    wfused_ref: (V, 4H)  f32     fused embedding @ W_ih + bias table
                                 (g-gate columns pre-scaled by 2)
    whh_ref   : (H, 4H)  f32     hidden->gates weight (g columns pre-scaled by 2)
    wlin_ref  : (H, C)   f32     classification head weight
    blin_ref  : (1, C)   f32     classification head bias
    scores_ref: (B, C)   f32     output
    gx_sc     : (T*B, 4H) f32    VMEM scratch for the hoisted input projection
    """
    TB = ids_ref.shape[0]
    V = wfused_ref.shape[0]
    H = whh_ref.shape[0]
    B = scores_ref.shape[0]
    T = TB // B
    G = 4 * H

    # Fused embedding lookup + input projection + bias as ONE MXU push:
    # one_hot(ids) @ Wfused.  Exact row selection; rides the otherwise idle MXU.
    ids = ids_ref[...]                                             # (TB, 1)
    vocab_lane = jax.lax.broadcasted_iota(jnp.int32, (TB, V), 1)   # (TB, V)
    onehot = (vocab_lane == ids).astype(jnp.float32)               # (TB, V)
    gx_sc[...] = jnp.dot(onehot, wfused_ref[...],
                         preferred_element_type=jnp.float32)       # (TB, 4H)

    w_hh = whh_ref[...]  # hoist the loop-invariant weight load

    # Hoisted per-lane affine so each step needs ONE full-width sigmoid:
    # on g lanes (inputs pre-scaled by 2): 2*sigmoid(2z) - 1 = tanh(z);
    # elsewhere: 1*sigmoid(z) + 0.
    lane = jax.lax.broadcasted_iota(jnp.int32, (B, G), 1)
    is_g = (lane >= 2 * H) & (lane < 3 * H)
    lane_scale = jnp.where(is_g, 2.0, 1.0).astype(jnp.float32)
    lane_offset = jnp.where(is_g, -1.0, 0.0).astype(jnp.float32)

    def step(t, carry):
        h_prev, c_prev = carry
        start = pl.multiple_of(t * B, 8)
        gates = gx_sc[pl.ds(start, B), :] + jnp.dot(
            h_prev, w_hh, preferred_element_type=jnp.float32)      # (B, 4H)

        act = jax.nn.sigmoid(gates) * lane_scale + lane_offset

        i_g = act[:, 0 * H:1 * H]
        f_g = act[:, 1 * H:2 * H]
        g_g = act[:, 2 * H:3 * H]
        o_g = act[:, 3 * H:4 * H]

        c_new = f_g * c_prev + i_g * g_g
        h_new = o_g * jnp.tanh(c_new)
        return h_new, c_new

    h0 = jnp.zeros((B, H), jnp.float32)
    c0 = jnp.zeros((B, H), jnp.float32)
    h_T, _ = jax.lax.fori_loop(0, T, step, (h0, c0), unroll=min(T, 8))

    # scores = linear(outputs[-1])
    scores_ref[...] = (
        jnp.dot(h_T, wlin_ref[...], preferred_element_type=jnp.float32)
        + blin_ref[...]
    ).astype(scores_ref.dtype)


def encoder_forward(token_ids, params):
    """token_ids: (T, B) int32.  Returns scores (B, class_num)."""
    emb_table = params["embedding"]          # (V, E)
    w_ih = params["w_ih"]                    # (E, 4H)
    w_hh = params["w_hh"]                    # (H, 4H)
    b = params["b"]                          # (1, 4H)  (= b_ih + b_hh)
    w_lin = params["w_lin"]                  # (H, C)
    b_lin = params["b_lin"]                  # (1, C)

    T, B = token_ids.shape
    V = emb_table.shape[0]
    H = w_hh.shape[0]
    C = w_lin.shape[1]
    G = 4 * H

    # Pad batch to the f32 sublane size (8): dense vregs / MXU rows for free.
    B_pad = _round_up(max(B, 8), 8)
    if B_pad != B:
        token_ids = jnp.pad(token_ids, ((0, 0), (0, B_pad - B)))

    # Fused table: Wfused[v] = embedding[v] @ W_ih + (b_ih + b_hh).  Pre-scale
    # the g-gate columns of BOTH Wfused and W_hh by 2 so the kernel can use
    # tanh(z) = 2*sigmoid(2z) - 1 with a single per-step sigmoid.
    g_scale = jnp.concatenate([
        jnp.ones((2 * H,), jnp.float32),
        jnp.full((H,), 2.0, jnp.float32),
        jnp.ones((H,), jnp.float32),
    ])[None, :]                                                    # (1, 4H)
    wfused = (emb_table @ w_ih + b) * g_scale                      # (V, 4H)
    w_hh_scaled = w_hh * g_scale                                   # (H, 4H)

    ids_flat = token_ids.reshape(T * B_pad, 1).astype(jnp.int32)

    # VMEM budget: all operands + gx scratch, x2 for buffering, +1 MiB
    # headroom; never below the 32 MiB default scoped limit, capped at the
    # 64 MiB v7x physical size.
    resident = 4 * (T * B_pad * 1 + V * G + H * G + H * C + C
                    + T * B_pad * G + B_pad * C)
    vmem_limit = int(min(64 << 20, max(2 * resident + (1 << 20), 32 << 20)))

    # TODO(synk): on v7x (2 TensorCores) add a leading batch-parallel grid axis
    # once B_pad >= 16; at the current sizes a single gridless call is optimal.
    scores = pl.pallas_call(
        encoder_kernel,
        out_shape=jax.ShapeDtypeStruct((B_pad, C), jnp.float32),
        scratch_shapes=[pltpu.VMEM((T * B_pad, G), jnp.float32)],
        compiler_params=pltpu.CompilerParams(vmem_limit_bytes=vmem_limit),
    )(ids_flat, wfused, w_hh_scaled, w_lin, b_lin)
    return scores[:B]


def make_params(key, vocab_size, embedding_dim, hidden_dim, class_num):
    ks = jax.random.split(key, 7)
    scale = 0.1
    embedding = scale * jax.random.normal(ks[0], (vocab_size, embedding_dim), jnp.float32)
    # PyTorch stores weight_ih as (4H, E), weight_hh as (4H, H); we keep the
    # transposed (E, 4H)/(H, 4H) layout so the kernel does x @ W directly.
    w_ih = scale * jax.random.normal(ks[1], (embedding_dim, 4 * hidden_dim), jnp.float32)
    w_hh = scale * jax.random.normal(ks[2], (hidden_dim, 4 * hidden_dim), jnp.float32)
    b_ih = scale * jax.random.normal(ks[3], (4 * hidden_dim,), jnp.float32)
    b_hh = scale * jax.random.normal(ks[4], (4 * hidden_dim,), jnp.float32)
    w_lin = scale * jax.random.normal(ks[5], (hidden_dim, class_num), jnp.float32)
    b_lin = scale * jax.random.normal(ks[6], (class_num,), jnp.float32)
    return {
        "embedding": embedding,
        "w_ih": w_ih,
        "w_hh": w_hh,
        "b": (b_ih + b_hh)[None, :],
        "w_lin": w_lin,
        "b_lin": b_lin[None, :],
    }


def reference_forward(token_ids, params):
    """Pure-JAX reference of the same forward pass (for a sanity check)."""
    emb = jnp.take(params["embedding"], token_ids, axis=0)   # (T, B, E)
    H = params["w_hh"].shape[0]
    B = token_ids.shape[1]
    h = jnp.zeros((B, H), jnp.float32)
    c = jnp.zeros((B, H), jnp.float32)

    def step(carry, x_t):
        h, c = carry
        gates = x_t @ params["w_ih"] + h @ params["w_hh"] + params["b"]
        i = jax.nn.sigmoid(gates[:, 0 * H:1 * H])
        f = jax.nn.sigmoid(gates[:, 1 * H:2 * H])
        g = jnp.tanh(gates[:, 2 * H:3 * H])
        o = jax.nn.sigmoid(gates[:, 3 * H:4 * H])
        c = f * c + i * g
        h = o * jnp.tanh(c)
        return (h, c), h

    (h, c), _ = jax.lax.scan(step, (h, c), emb)
    return h @ params["w_lin"] + params["b_lin"]


if __name__ == "__main__":
    # args: rnn_type='lstm', num_layers=1, num_directions=1
    VOCAB = 50
    EMB_DIM = 16
    HIDDEN = 32
    CLASS_NUM = 4
    SEQ = 8
    BATCH = 4

    key = jax.random.PRNGKey(0)
    pkey, xkey = jax.random.split(key)
    params = make_params(pkey, VOCAB, EMB_DIM, HIDDEN, CLASS_NUM)

    # x: (seq_len, batch) int token ids — PyTorch time-major convention.
    x = jax.random.randint(xkey, (SEQ, BATCH), 0, VOCAB, dtype=jnp.int32)

    scores = encoder_forward(x, params)
    scores = jax.block_until_ready(scores)

    ref = jax.block_until_ready(reference_forward(x, params))
    assert scores.shape == (BATCH, CLASS_NUM)
    assert jnp.allclose(scores, ref, atol=1e-4, rtol=1e-4)

    print("KERNEL_OK")
</pallas_src>

<mosaic_0001>
module attributes {stable_mosaic.version = 11 : i64} {
  func.func @encoder_kernel(%arg0: memref<64x1xi32, #tpu.memory_space<vmem>>, %arg1: memref<50x128xf32, #tpu.memory_space<vmem>>, %arg2: memref<32x128xf32, #tpu.memory_space<vmem>>, %arg3: memref<32x4xf32, #tpu.memory_space<vmem>>, %arg4: memref<1x4xf32, #tpu.memory_space<vmem>>, %arg5: memref<8x4xf32, #tpu.memory_space<vmem>>, %arg6: memref<64x128xf32, #tpu.memory_space<vmem>>) attributes {dimension_semantics = [], scalar_prefetch = 0 : i64, scratch_operands = 1 : i64, tpu.core_type = #tpu.core_type<tc>} {
    %c0 = arith.constant 0 : index
    %c0_0 = arith.constant 0 : index
    %0 = vector.load %arg0[%c0, %c0_0] : memref<64x1xi32, #tpu.memory_space<vmem>>, vector<64x1xi32>
    %1 = tpu.iota {dimensions = array<i32: 1>} : vector<64x50xi32>
    %2 = vector.broadcast %0 : vector<64x1xi32> to vector<64x50xi32>
    %3 = arith.cmpi eq, %1, %2 : vector<64x50xi32>
    %4 = arith.extui %3 : vector<64x50xi1> to vector<64x50xi32>
    %5 = arith.sitofp %4 : vector<64x50xi32> to vector<64x50xf32>
    %c0_1 = arith.constant 0 : index
    %c0_2 = arith.constant 0 : index
    %6 = vector.load %arg1[%c0_1, %c0_2] : memref<50x128xf32, #tpu.memory_space<vmem>>, vector<50x128xf32>
    %cst = arith.constant dense<0.000000e+00> : vector<64x128xf32>
    %7 = tpu.matmul %5, %6, %cst {dimension_numbers = #tpu.dot_dimension_numbers<[1], [0], [0], [1], [0, 0, 1, 1], [], []>} : vector<64x50xf32>, vector<50x128xf32>, vector<64x128xf32> -> vector<64x128xf32>
    %c0_3 = arith.constant 0 : index
    %c0_4 = arith.constant 0 : index
    %8 = vector.load %arg6[%c0_3, %c0_4] : memref<64x128xf32, #tpu.memory_space<vmem>>, vector<64x128xf32>
    tpu.vector_store %arg6[%c0_3, %c0_4], %7 {strides = array<i32>} : memref<64x128xf32, #tpu.memory_space<vmem>>, vector<64x128xf32>,
    %c0_5 = arith.constant 0 : index
    %c0_6 = arith.constant 0 : index
    %9 = vector.load %arg2[%c0_5, %c0_6] : memref<32x128xf32, #tpu.memory_space<vmem>>, vector<32x128xf32>
    %10 = tpu.iota {dimensions = array<i32: 1>} : vector<8x128xi32>
    %c64_i32 = arith.constant 64 : i32
    %11 = vector.broadcast %c64_i32 : i32 to vector<8x128xi32>
    %12 = arith.cmpi sge, %10, %11 : vector<8x128xi32>
    %c96_i32 = arith.constant 96 : i32
    %13 = vector.broadcast %c96_i32 : i32 to vector<8x128xi32>
    %14 = arith.cmpi slt, %10, %13 : vector<8x128xi32>
    %15 = arith.andi %12, %14 : vector<8x128xi1>
    %cst_7 = arith.constant 2.000000e+00 : f32
    %cst_8 = arith.constant 1.000000e+00 : f32
    %16 = vector.broadcast %cst_7 : f32 to vector<8x128xf32>
    %17 = vector.broadcast %cst_8 : f32 to vector<8x128xf32>
    %18 = arith.select %15, %16, %17 : vector<8x128xi1>, vector<8x128xf32>
    %cst_9 = arith.constant -1.000000e+00 : f32
    %cst_10 = arith.constant 0.000000e+00 : f32
    %19 = vector.broadcast %cst_9 : f32 to vector<8x128xf32>
    %20 = vector.broadcast %cst_10 : f32 to vector<8x128xf32>
    %21 = arith.select %15, %19, %20 : vector<8x128xi1>, vector<8x128xf32>
    %cst_11 = arith.constant 0.000000e+00 : f32
    %22 = vector.broadcast %cst_11 : f32 to vector<8x32xf32>
    %cst_12 = arith.constant 0.000000e+00 : f32
    %23 = vector.broadcast %cst_12 : f32 to vector<8x32xf32>
    %c0_i32 = arith.constant 0 : i32
    %c8_i32 = arith.constant 8 : i32
    %24 = arith.muli %c0_i32, %c8_i32 : i32
    %25 = tpu.assume_multiple %24, 8 : i32
    %26 = arith.index_cast %25 : i32 to index
    %c0_13 = arith.constant 0 : index
    %27 = vector.load %arg6[%26, %c0_13] : memref<64x128xf32, #tpu.memory_space<vmem>>, vector<8x128xf32>
    %cst_14 = arith.constant dense<0.000000e+00> : vector<8x128xf32>
    %28 = tpu.matmul %22, %9, %cst_14 {dimension_numbers = #tpu.dot_dimension_numbers<[1], [0], [0], [1], [0, 0, 1, 1], [], []>} : vector<8x32xf32>, vector<32x128xf32>, vector<8x128xf32> -> vector<8x128xf32>
    %29 = arith.addf %27, %28 : vector<8x128xf32>
    %30 = arith.negf %29 : vector<8x128xf32>
    %31 = math.exp %30 : vector<8x128xf32>
    %cst_15 = arith.constant 1.000000e+00 : f32
    %32 = vector.broadcast %cst_15 : f32 to vector<8x128xf32>
    %33 = arith.addf %32, %31 : vector<8x128xf32>
    %34 = arith.divf %32, %33 : vector<8x128xf32>
    %35 = arith.mulf %34, %18 : vector<8x128xf32>
    %36 = arith.addf %35, %21 : vector<8x128xf32>
    %37 = vector.extract_strided_slice %36 {offsets = [0, 0], sizes = [8, 32], strides = [1, 1]} : vector<8x128xf32> to vector<8x32xf32>
    %38 = vector.extract_strided_slice %36 {offsets = [0, 32], sizes = [8, 32], strides = [1, 1]} : vector<8x128xf32> to vector<8x32xf32>
    %39 = vector.extract_strided_slice %36 {offsets = [0, 64], sizes = [8, 32], strides = [1, 1]} : vector<8x128xf32> to vector<8x32xf32>
    %40 = vector.extract_strided_slice %36 {offsets = [0, 96], sizes = [8, 32], strides = [1, 1]} : vector<8x128xf32> to vector<8x32xf32>
    %41 = arith.mulf %38, %23 : vector<8x32xf32>
    %42 = arith.mulf %37, %39 : vector<8x32xf32>
    %43 = arith.addf %41, %42 : vector<8x32xf32>
    %44 = math.tanh %43 : vector<8x32xf32>
    %45 = arith.mulf %40, %44 : vector<8x32xf32>
    %c1_i32 = arith.constant 1 : i32
    %c8_i32_16 = arith.constant 8 : i32
    %46 = arith.muli %c1_i32, %c8_i32_16 : i32
    %47 = tpu.assume_multiple %46, 8 : i32
    %48 = arith.index_cast %47 : i32 to index
    %c0_17 = arith.constant 0 : index
    %49 = vector.load %arg6[%48, %c0_17] : memref<64x128xf32, #tpu.memory_space<vmem>>, vector<8x128xf32>
    %cst_18 = arith.constant dense<0.000000e+00> : vector<8x128xf32>
    %50 = tpu.matmul %45, %9, %cst_18 {dimension_numbers = #tpu.dot_dimension_numbers<[1], [0], [0], [1], [0, 0, 1, 1], [], []>} : vector<8x32xf32>, vector<32x128xf32>, vector<8x128xf32> -> vector<8x128xf32>
    %51 = arith.addf %49, %50 : vector<8x128xf32>
    %52 = arith.negf %51 : vector<8x128xf32>
    %53 = math.exp %52 : vector<8x128xf32>
    %cst_19 = arith.constant 1.000000e+00 : f32
    %54 = vector.broadcast %cst_19 : f32 to vector<8x128xf32>
    %55 = arith.addf %54, %53 : vector<8x128xf32>
    %56 = arith.divf %54, %55 : vector<8x128xf32>
    %57 = arith.mulf %56, %18 : vector<8x128xf32>
    %58 = arith.addf %57, %21 : vector<8x128xf32>
    %59 = vector.extract_strided_slice %58 {offsets = [0, 0], sizes = [8, 32], strides = [1, 1]} : vector<8x128xf32> to vector<8x32xf32>
    %60 = vector.extract_strided_slice %58 {offsets = [0, 32], sizes = [8, 32], strides = [1, 1]} : vector<8x128xf32> to vector<8x32xf32>
    %61 = vector.extract_strided_slice %58 {offsets = [0, 64], sizes = [8, 32], strides = [1, 1]} : vector<8x128xf32> to vector<8x32xf32>
    %62 = vector.extract_strided_slice %58 {offsets = [0, 96], sizes = [8, 32], strides = [1, 1]} : vector<8x128xf32> to vector<8x32xf32>
    %63 = arith.mulf %60, %43 : vector<8x32xf32>
    %64 = arith.mulf %59, %61 : vector<8x32xf32>
    %65 = arith.addf %63, %64 : vector<8x32xf32>
    %66 = math.tanh %65 : vector<8x32xf32>
    %67 = arith.mulf %62, %66 : vector<8x32xf32>
    %c2_i32 = arith.constant 2 : i32
    %c8_i32_20 = arith.constant 8 : i32
    %68 = arith.muli %c2_i32, %c8_i32_20 : i32
    %69 = tpu.assume_multiple %68, 8 : i32
    %70 = arith.index_cast %69 : i32 to index
    %c0_21 = arith.constant 0 : index
    %71 = vector.load %arg6[%70, %c0_21] : memref<64x128xf32, #tpu.memory_space<vmem>>, vector<8x128xf32>
    %cst_22 = arith.constant dense<0.000000e+00> : vector<8x128xf32>
    %72 = tpu.matmul %67, %9, %cst_22 {dimension_numbers = #tpu.dot_dimension_numbers<[1], [0], [0], [1], [0, 0, 1, 1], [], []>} : vector<8x32xf32>, vector<32x128xf32>, vector<8x128xf32> -> vector<8x128xf32>
    %73 = arith.addf %71, %72 : vector<8x128xf32>
    %74 = arith.negf %73 : vector<8x128xf32>
    %75 = math.exp %74 : vector<8x128xf32>
    %cst_23 = arith.constant 1.000000e+00 : f32
    %76 = vector.broadcast %cst_23 : f32 to vector<8x128xf32>
    %77 = arith.addf %76, %75 : vector<8x128xf32>
    %78 = arith.divf %76, %77 : vector<8x128xf32>
    %79 = arith.mulf %78, %18 : vector<8x128xf32>
    %80 = arith.addf %79, %21 : vector<8x128xf32>
    %81 = vector.extract_strided_slice %80 {offsets = [0, 0], sizes = [8, 32], strides = [1, 1]} : vector<8x128xf32> to vector<8x32xf32>
    %82 = vector.extract_strided_slice %80 {offsets = [0, 32], sizes = [8, 32], strides = [1, 1]} : vector<8x128xf32> to vector<8x32xf32>
    %83 = vector.extract_strided_slice %80 {offsets = [0, 64], sizes = [8, 32], strides = [1, 1]} : vector<8x128xf32> to vector<8x32xf32>
    %84 = vector.extract_strided_slice %80 {offsets = [0, 96], sizes = [8, 32], strides = [1, 1]} : vector<8x128xf32> to vector<8x32xf32>
    %85 = arith.mulf %82, %65 : vector<8x32xf32>
    %86 = arith.mulf %81, %83 : vector<8x32xf32>
    %87 = arith.addf %85, %86 : vector<8x32xf32>
    %88 = math.tanh %87 : vector<8x32xf32>
    %89 = arith.mulf %84, %88 : vector<8x32xf32>
    %c3_i32 = arith.constant 3 : i32
    %c8_i32_24 = arith.constant 8 : i32
    %90 = arith.muli %c3_i32, %c8_i32_24 : i32
    %91 = tpu.assume_multiple %90, 8 : i32
    %92 = arith.index_cast %91 : i32 to index
    %c0_25 = arith.constant 0 : index
    %93 = vector.load %arg6[%92, %c0_25] : memref<64x128xf32, #tpu.memory_space<vmem>>, vector<8x128xf32>
    %cst_26 = arith.constant dense<0.000000e+00> : vector<8x128xf32>
    %94 = tpu.matmul %89, %9, %cst_26 {dimension_numbers = #tpu.dot_dimension_numbers<[1], [0], [0], [1], [0, 0, 1, 1], [], []>} : vector<8x32xf32>, vector<32x128xf32>, vector<8x128xf32> -> vector<8x128xf32>
    %95 = arith.addf %93, %94 : vector<8x128xf32>
    %96 = arith.negf %95 : vector<8x128xf32>
    %97 = math.exp %96 : vector<8x128xf32>
    %cst_27 = arith.constant 1.000000e+00 : f32
    %98 = vector.broadcast %cst_27 : f32 to vector<8x128xf32>
    %99 = arith.addf %98, %97 : vector<8x128xf32>
    %100 = arith.divf %98, %99 : vector<8x128xf32>
    %101 = arith.mulf %100, %18 : vector<8x128xf32>
    %102 = arith.addf %101, %21 : vector<8x128xf32>
    %103 = vector.extract_strided_slice %102 {offsets = [0, 0], sizes = [8, 32], strides = [1, 1]} : vector<8x128xf32> to vector<8x32xf32>
    %104 = vector.extract_strided_slice %102 {offsets = [0, 32], sizes = [8, 32], strides = [1, 1]} : vector<8x128xf32> to vector<8x32xf32>
    %105 = vector.extract_strided_slice %102 {offsets = [0, 64], sizes = [8, 32], strides = [1, 1]} : vector<8x128xf32> to vector<8x32xf32>
    %106 = vector.extract_strided_slice %102 {offsets = [0, 96], sizes = [8, 32], strides = [1, 1]} : vector<8x128xf32> to vector<8x32xf32>
    %107 = arith.mulf %104, %87 : vector<8x32xf32>
    %108 = arith.mulf %103, %105 : vector<8x32xf32>
    %109 = arith.addf %107, %108 : vector<8x32xf32>
    %110 = math.tanh %109 : vector<8x32xf32>
    %111 = arith.mulf %106, %110 : vector<8x32xf32>
    %c4_i32 = arith.constant 4 : i32
    %c8_i32_28 = arith.constant 8 : i32
    %112 = arith.muli %c4_i32, %c8_i32_28 : i32
    %113 = tpu.assume_multiple %112, 8 : i32
    %114 = arith.index_cast %113 : i32 to index
    %c0_29 = arith.constant 0 : index
    %115 = vector.load %arg6[%114, %c0_29] : memref<64x128xf32, #tpu.memory_space<vmem>>, vector<8x128xf32>
    %cst_30 = arith.constant dense<0.000000e+00> : vector<8x128xf32>
    %116 = tpu.matmul %111, %9, %cst_30 {dimension_numbers = #tpu.dot_dimension_numbers<[1], [0], [0], [1], [0, 0, 1, 1], [], []>} : vector<8x32xf32>, vector<32x128xf32>, vector<8x128xf32> -> vector<8x128xf32>
    %117 = arith.addf %115, %116 : vector<8x128xf32>
    %118 = arith.negf %117 : vector<8x128xf32>
    %119 = math.exp %118 : vector<8x128xf32>
    %cst_31 = arith.constant 1.000000e+00 : f32
    %120 = vector.broadcast %cst_31 : f32 to vector<8x128xf32>
    %121 = arith.addf %120, %119 : vector<8x128xf32>
    %122 = arith.divf %120, %121 : vector<8x128xf32>
    %123 = arith.mulf %122, %18 : vector<8x128xf32>
    %124 = arith.addf %123, %21 : vector<8x128xf32>
    %125 = vector.extract_strided_slice %124 {offsets = [0, 0], sizes = [8, 32], strides = [1, 1]} : vector<8x128xf32> to vector<8x32xf32>
    %126 = vector.extract_strided_slice %124 {offsets = [0, 32], sizes = [8, 32], strides = [1, 1]} : vector<8x128xf32> to vector<8x32xf32>
    %127 = vector.extract_strided_slice %124 {offsets = [0, 64], sizes = [8, 32], strides = [1, 1]} : vector<8x128xf32> to vector<8x32xf32>
    %128 = vector.extract_strided_slice %124 {offsets = [0, 96], sizes = [8, 32], strides = [1, 1]} : vector<8x128xf32> to vector<8x32xf32>
    %129 = arith.mulf %126, %109 : vector<8x32xf32>
    %130 = arith.mulf %125, %127 : vector<8x32xf32>
    %131 = arith.addf %129, %130 : vector<8x32xf32>
    %132 = math.tanh %131 : vector<8x32xf32>
    %133 = arith.mulf %128, %132 : vector<8x32xf32>
    %c5_i32 = arith.constant 5 : i32
    %c8_i32_32 = arith.constant 8 : i32
    %134 = arith.muli %c5_i32, %c8_i32_32 : i32
    %135 = tpu.assume_multiple %134, 8 : i32
    %136 = arith.index_cast %135 : i32 to index
    %c0_33 = arith.constant 0 : index
    %137 = vector.load %arg6[%136, %c0_33] : memref<64x128xf32, #tpu.memory_space<vmem>>, vector<8x128xf32>
    %cst_34 = arith.constant dense<0.000000e+00> : vector<8x128xf32>
    %138 = tpu.matmul %133, %9, %cst_34 {dimension_numbers = #tpu.dot_dimension_numbers<[1], [0], [0], [1], [0, 0, 1, 1], [], []>} : vector<8x32xf32>, vector<32x128xf32>, vector<8x128xf32> -> vector<8x128xf32>
    %139 = arith.addf %137, %138 : vector<8x128xf32>
    %140 = arith.negf %139 : vector<8x128xf32>
    %141 = math.exp %140 : vector<8x128xf32>
    %cst_35 = arith.constant 1.000000e+00 : f32
    %142 = vector.broadcast %cst_35 : f32 to vector<8x128xf32>
    %143 = arith.addf %142, %141 : vector<8x128xf32>
    %144 = arith.divf %142, %143 : vector<8x128xf32>
    %145 = arith.mulf %144, %18 : vector<8x128xf32>
    %146 = arith.addf %145, %21 : vector<8x128xf32>
    %147 = vector.extract_strided_slice %146 {offsets = [0, 0], sizes = [8, 32], strides = [1, 1]} : vector<8x128xf32> to vector<8x32xf32>
    %148 = vector.extract_strided_slice %146 {offsets = [0, 32], sizes = [8, 32], strides = [1, 1]} : vector<8x128xf32> to vector<8x32xf32>
    %149 = vector.extract_strided_slice %146 {offsets = [0, 64], sizes = [8, 32], strides = [1, 1]} : vector<8x128xf32> to vector<8x32xf32>
    %150 = vector.extract_strided_slice %146 {offsets = [0, 96], sizes = [8, 32], strides = [1, 1]} : vector<8x128xf32> to vector<8x32xf32>
    %151 = arith.mulf %148, %131 : vector<8x32xf32>
    %152 = arith.mulf %147, %149 : vector<8x32xf32>
    %153 = arith.addf %151, %152 : vector<8x32xf32>
    %154 = math.tanh %153 : vector<8x32xf32>
    %155 = arith.mulf %150, %154 : vector<8x32xf32>
    %c6_i32 = arith.constant 6 : i32
    %c8_i32_36 = arith.constant 8 : i32
    %156 = arith.muli %c6_i32, %c8_i32_36 : i32
    %157 = tpu.assume_multiple %156, 8 : i32
    %158 = arith.index_cast %157 : i32 to index
    %c0_37 = arith.constant 0 : index
    %159 = vector.load %arg6[%158, %c0_37] : memref<64x128xf32, #tpu.memory_space<vmem>>, vector<8x128xf32>
    %cst_38 = arith.constant dense<0.000000e+00> : vector<8x128xf32>
    %160 = tpu.matmul %155, %9, %cst_38 {dimension_numbers = #tpu.dot_dimension_numbers<[1], [0], [0], [1], [0, 0, 1, 1], [], []>} : vector<8x32xf32>, vector<32x128xf32>, vector<8x128xf32> -> vector<8x128xf32>
    %161 = arith.addf %159, %160 : vector<8x128xf32>
    %162 = arith.negf %161 : vector<8x128xf32>
    %163 = math.exp %162 : vector<8x128xf32>
    %cst_39 = arith.constant 1.000000e+00 : f32
    %164 = vector.broadcast %cst_39 : f32 to vector<8x128xf32>
    %165 = arith.addf %164, %163 : vector<8x128xf32>
    %166 = arith.divf %164, %165 : vector<8x128xf32>
    %167 = arith.mulf %166, %18 : vector<8x128xf32>
    %168 = arith.addf %167, %21 : vector<8x128xf32>
    %169 = vector.extract_strided_slice %168 {offsets = [0, 0], sizes = [8, 32], strides = [1, 1]} : vector<8x128xf32> to vector<8x32xf32>
    %170 = vector.extract_strided_slice %168 {offsets = [0, 32], sizes = [8, 32], strides = [1, 1]} : vector<8x128xf32> to vector<8x32xf32>
    %171 = vector.extract_strided_slice %168 {offsets = [0, 64], sizes = [8, 32], strides = [1, 1]} : vector<8x128xf32> to vector<8x32xf32>
    %172 = vector.extract_strided_slice %168 {offsets = [0, 96], sizes = [8, 32], strides = [1, 1]} : vector<8x128xf32> to vector<8x32xf32>
    %173 = arith.mulf %170, %153 : vector<8x32xf32>
    %174 = arith.mulf %169, %171 : vector<8x32xf32>
    %175 = arith.addf %173, %174 : vector<8x32xf32>
    %176 = math.tanh %175 : vector<8x32xf32>
    %177 = arith.mulf %172, %176 : vector<8x32xf32>
    %c7_i32 = arith.constant 7 : i32
    %c8_i32_40 = arith.constant 8 : i32
    %178 = arith.muli %c7_i32, %c8_i32_40 : i32
    %179 = tpu.assume_multiple %178, 8 : i32
    %180 = arith.index_cast %179 : i32 to index
    %c0_41 = arith.constant 0 : index
    %181 = vector.load %arg6[%180, %c0_41] : memref<64x128xf32, #tpu.memory_space<vmem>>, vector<8x128xf32>
    %cst_42 = arith.constant dense<0.000000e+00> : vector<8x128xf32>
    %182 = tpu.matmul %177, %9, %cst_42 {dimension_numbers = #tpu.dot_dimension_numbers<[1], [0], [0], [1], [0, 0, 1, 1], [], []>} : vector<8x32xf32>, vector<32x128xf32>, vector<8x128xf32> -> vector<8x128xf32>
    %183 = arith.addf %181, %182 : vector<8x128xf32>
    %184 = arith.negf %183 : vector<8x128xf32>
    %185 = math.exp %184 : vector<8x128xf32>
    %cst_43 = arith.constant 1.000000e+00 : f32
    %186 = vector.broadcast %cst_43 : f32 to vector<8x128xf32>
    %187 = arith.addf %186, %185 : vector<8x128xf32>
    %188 = arith.divf %186, %187 : vector<8x128xf32>
    %189 = arith.mulf %188, %18 : vector<8x128xf32>
    %190 = arith.addf %189, %21 : vector<8x128xf32>
    %191 = vector.extract_strided_slice %190 {offsets = [0, 0], sizes = [8, 32], strides = [1, 1]} : vector<8x128xf32> to vector<8x32xf32>
    %192 = vector.extract_strided_slice %190 {offsets = [0, 32], sizes = [8, 32], strides = [1, 1]} : vector<8x128xf32> to vector<8x32xf32>
    %193 = vector.extract_strided_slice %190 {offsets = [0, 64], sizes = [8, 32], strides = [1, 1]} : vector<8x128xf32> to vector<8x32xf32>
    %194 = vector.extract_strided_slice %190 {offsets = [0, 96], sizes = [8, 32], strides = [1, 1]} : vector<8x128xf32> to vector<8x32xf32>
    %195 = arith.mulf %192, %175 : vector<8x32xf32>
    %196 = arith.mulf %191, %193 : vector<8x32xf32>
    %197 = arith.addf %195, %196 : vector<8x32xf32>
    %198 = math.tanh %197 : vector<8x32xf32>
    %199 = arith.mulf %194, %198 : vector<8x32xf32>
    %c8_i32_44 = arith.constant 8 : i32
    %c0_45 = arith.constant 0 : index
    %c0_46 = arith.constant 0 : index
    %200 = vector.load %arg3[%c0_45, %c0_46] : memref<32x4xf32, #tpu.memory_space<vmem>>, vector<32x4xf32>
    %cst_47 = arith.constant dense<0.000000e+00> : vector<8x4xf32>
    %201 = tpu.matmul %199, %200, %cst_47 {dimension_numbers = #tpu.dot_dimension_numbers<[1], [0], [0], [1], [0, 0, 1, 1], [], []>} : vector<8x32xf32>, vector<32x4xf32>, vector<8x4xf32> -> vector<8x4xf32>
    %c0_48 = arith.constant 0 : index
    %c0_49 = arith.constant 0 : index
    %202 = vector.load %arg4[%c0_48, %c0_49] : memref<1x4xf32, #tpu.memory_space<vmem>>, vector<1x4xf32>
    %203 = vector.broadcast %202 : vector<1x4xf32> to vector<8x4xf32>
    %204 = arith.addf %201, %203 : vector<8x4xf32>
    %c0_50 = arith.constant 0 : index
    %c0_51 = arith.constant 0 : index
    %205 = vector.load %arg5[%c0_50, %c0_51] : memref<8x4xf32, #tpu.memory_space<vmem>>, vector<8x4xf32>
    tpu.vector_store %arg5[%c0_50, %c0_51], %204 {strides = array<i32>} : memref<8x4xf32, #tpu.memory_space<vmem>>, vector<8x4xf32>,
    return
  }
}

</mosaic_0001>

<bundles_post_ra>
// kernel: tpu_custom_call.1
= control target key start
LH: loop header
LB: loop body
LE: loop exit
PB: predicated region body
PF: predicated region fallthrough
CT: control target
= control target key end

     0   :  { %vm110_vm0 = vcmask 1041408   ;;  %v1425_v0 = vmov 0   ;;  %v1426_v3 = vmov 0.0   ;;  %vm1427_vm1 = vmmov 0   ;;  %s1732_s0 = inlined_call_operand.vmem [shape: s32[64,1], index: 0, kind: input, shape index: {}]   ;;  %s1733_s1 = inlined_call_operand.vmem [shape: f32[50,128], index: 1, kind: input, shape index: {}]   ;;  %s1734_s2 = inlined_call_operand.vmem [shape: f32[32,128], index: 2, kind: input, shape index: {}]   ;;  %s1735_s3 = inlined_call_operand.vmem [shape: f32[32,4], index: 3, kind: input, shape index: {}]   ;;  %s1736_s4 = inlined_call_operand.vmem [shape: f32[1,4], index: 4, kind: input, shape index: {}]   ;;  %s1737_s5 = inlined_call_operand.vmem [shape: f32[8,4], index: 5, kind: output, shape index: {}]  }
   0x1   :  { %1375 = vset.pattern.permute.xlu0 %v1425_v0  ;;  %v20_v1 = vld [vmem:[%s1732_s0] sm:$0xff]  ;;  %v84_v2 = vld [vmem:[%s1733_s1 + $0x30] sm:$0x3]  ;;  %1270 = vmatprep.subr.mxu1 %v1426_v3  ;;  %v83_v4 = vld [vmem:[%s1733_s1 + $0x28] sm:$0xff]  ;;  %v28_v15 = vlaneseq  ;;  %vm85_vm2 = vcmask 408576   ;;  %v1428_v29 = vmov 1.0  }
   0x2   :  { %31 = vperm.xlu0 %1375, %v20_v1   ;;  %1244 = vmatprep.subr.msk.mxu0 %vm110_vm0, %v84_v2  ;;  %v21_v5 = vld [vmem:[%s1732_s0 + $0x8] sm:$0xff]  ;;  %v82_v6 = vld [vmem:[%s1733_s1 + $0x20] sm:$0xff]  ;;  %v1480_v7 = vld [vmem:[%s1734_s2 + $0x18] sm:$0xff]  ;;  %vm237_vm8 = vcmask 261120   ;;  %vm1144_vm15 = vcmask 31744  }
   0x3   :  { %1245 = vmatpush3.msk.msra.mxu0 %vm110_vm0, %v84_v2  ;;  %1278 = vmatprep.mubr.msk.f32.mxu1 %vm1427_vm1, %v1426_v3  ;;  %v1488_v8 = vld [vmem:[%s1734_s2 + $0x10] sm:$0xff]  ;;  %v81_v9 = vld [vmem:[%s1733_s1 + $0x18] sm:$0xff]  ;;  %v1497_v10 = vld [vmem:[%s1734_s2 + $0x8] sm:$0xff]  ;;  %v1531_v16 = vand.u32 127, %v28_v15 }
   0x4   :  { %1246 = vmatprep.subr.mxu0 %v83_v4  ;;  %1271 = vmatpush3.msra.mxu1 %v1480_v7  ;;  %v80_v11 = vld [vmem:[%s1733_s1 + $0x10] sm:$0xff]  ;;  %v1507_v12 = vld [vmem:[%s1734_s2] sm:$0xff]  ;;  %v79_v13 = vld [vmem:[%s1733_s1 + $0x8] sm:$0xff]  ;;  %s1430_s2 = smov 32  }
   0x5   :  { %1247 = vmatpush3.msra.mxu0 %v83_v4  ;;  %1272 = vmatprep.subr.mxu1 %v1426_v3  ;;  %v78_v14 = vld [vmem:[%s1733_s1] sm:$0xff]  ;;  %vm231_vm5 = vcmp.ge.s32.totalorder %v1531_v16, 64  ;;  %vm232_vm6 = vcmp.lt.s32.totalorder %v1531_v16, 96  ;;  %s1429_s1 = smov 64   ;;  %v22_v55 = vld [vmem:[%s1732_s0 + $0x10] sm:$0xff]  ;;  %v23_v62 = vld [vmem:[%s1732_s0 + $0x18] sm:$0xff] }
   0x6   :  { %34 = vperm.xlu0 %1375, %v21_v5   ;;  %1248 = vmatprep.subr.mxu0 %v82_v6  ;;  %vm233_vm7 = vmand %vm231_vm5, %vm232_vm6 }
   0x7   :  { %1249 = vmatpush3.msra.mxu0 %v82_v6  ;;  %1273 = vmatpush3.msra.mxu1 %v1488_v8  ;;  %v1549_v30 = vsel %vm233_vm7, 2.0, %v1428_v29  ;;  %v1552_v32 = vsel %vm233_vm7, -1.0, %v1426_v3 }
   0x8   :  { %1250 = vmatprep.subr.mxu0 %v81_v9  ;;  %1274 = vmatprep.subr.mxu1 %v1426_v3 }
   0x9   :  { %1251 = vmatpush3.msra.mxu0 %v81_v9  ;;  %1275 = vmatpush3.msra.mxu1 %v1497_v10 }
   0xa   :  { %1252 = vmatprep.subr.mxu0 %v80_v11  ;;  %1276 = vmatprep.subr.mxu1 %v1426_v3 }
   0xb   :  { %1253 = vmatpush3.msra.mxu0 %v80_v11  ;;  %1277 = vmatpush3.msra.mxu1 %v1507_v12 }
   0xc   :  { %1254 = vmatprep.subr.mxu0 %v79_v13  ;;  %1279 = vmatmul.mubr.f32.vlgmr.msra.gmra.mxu1 %v1426_v3 }
   0xd   :  { %1255 = vmatpush3.msra.mxu0 %v79_v13  ;;  %1281 = vmatprep.subr.mxu1 %v1426_v3 }
   0xe   :  { %1256 = vmatprep.subr.mxu0 %v78_v14  ;;  %1282 = vmatpush3.msra.mxu1 %v1480_v7 }
   0xf   :  { %1257 = vmatpush3.msra.mxu0 %v78_v14  ;;  %1283 = vmatprep.subr.mxu1 %v1426_v3 }
  0x10   :  { %1284 = vmatpush3.msra.mxu1 %v1488_v8  ;;  %1289 = vmatprep.mubr.msk.f32.mxu1 %vm1427_vm1, %v1426_v3 }
  0x11   :  { %1285 = vmatprep.subr.mxu1 %v1426_v3  ;;  %1376 = vset.pattern.permute.xlu1 %v1425_v0 }
  0x12   :  { %1286 = vmatpush3.msra.mxu1 %v1497_v10  ;;  %1303 = vmatprep.subr.mxu0 %v1426_v3 }
  0x13   :  { %1287 = vmatprep.subr.mxu1 %v1426_v3 }
  0x14   :  { %1288 = vmatpush3.msra.mxu1 %v1507_v12 }
  0x15   :  { %1292 = vmatprep.subr.mxu1 %v1426_v3 }
  0x7d   :  { %v32_v17 = vpop.permute.xlu0 %31 }
  0x7e   :  { %vm54_vm3 = vcmp.eq.s32.totalorder %v1531_v16, %v32_v17 }
  0x7f   :  { %v1150_v18 = vsel %vm54_vm3, 1.0, %v1426_v3 }
  0x80   :  { %1258 = vmatprep.mubr.msk.f32.mxu0 %vm85_vm2, %v1150_v18 }
  0x81   :  { %v35_v19 = vpop.permute.xlu0 %34 }
  0x82   :  { %vm55_vm4 = vcmp.eq.s32.totalorder %v1531_v16, %v35_v19 }
  0x83   :  { %v1151_v20 = vsel %vm55_vm4, 1.0, %v1426_v3 }
  0x84   :  { %1259 = vmatmul.mubr.msk.f32.vlgmr.msra.gmra.mxu0 %vm85_vm2, %v1151_v20 }
  0x85   :  { %1304 = vmatpush3.msra.mxu0 %v1480_v7 }
  0x86   :  { %1305 = vmatprep.subr.mxu0 %v1426_v3 }
  0x87   :  { %1306 = vmatpush3.msra.mxu0 %v1488_v8 }
  0x88   :  { %1307 = vmatprep.subr.mxu0 %v1426_v3 }
  0x89   :  { %1308 = vmatpush3.msra.mxu0 %v1497_v10 }
  0x8a   :  { %1309 = vmatprep.subr.mxu0 %v1426_v3 }
  0x8b   :  { %1310 = vmatpush3.msra.mxu0 %v1507_v12 }
  0x8c   :  { %1325 = vmatprep.subr.mxu0 %v1426_v3 }
  0xcc   :  { %v307_v21 = vpop.f32.mrf.mxu1 }
  0xce   :  { %v1280_v22 = vpop.f32.mrf.mxu1 }
 0x144   :  { %v1260_v23 = vpop.f32.mrf.mxu0 }
 0x146   :  { %v180_v24 = vpop.f32.mrf.mxu0 }
 0x147   :  { %v311_v25 = vadd.f32 %v307_v21, %v180_v24  ;;  %v26_v24 = vld [vmem:[%s1732_s0 + $0x30] sm:$0xff] }
 0x149   :  { %v1167_v26 = vmul.f32 -1.442695, %v311_v25 }
 0x14b   :  { %1377 = vpow2.f32 %v1167_v26 }
 0x158   :  { %v1378_v27 = vpop.eup %1377 }
 0x159   :  { %v315_v28 = vadd.f32 1.0, %v1378_v27 }
 0x15b   :  { %1379 = vrcp.f32 %v315_v28 }
 0x168   :  { %v1380_v31 = vpop.eup %1379 }
 0x169   :  { %v318_v33 = vmul.f32 %v1380_v31, %v1549_v30 }
 0x16b   :  { %v319_v34 = vadd.f32 %v318_v33, %v1552_v32  ;;  %v25_v33 = vld [vmem:[%s1732_s0 + $0x28] sm:$0xff] }
 0x16d   :  { %322 = vrot.lane.b32.xlu1 %v319_v34, %s1429_s1  ;;  %v320_v37 = vmul.f32 0.0, %v319_v34 }
 0x1df   :  { %v323_v35 = vpop.permute.xlu1 %322 }
 0x1e0   :  { %v325_v36 = vmul.f32 %v323_v35, %v319_v34 }
 0x1e2   :  { %327 = vrot.lane.b32.xlu1 %v325_v36, %s1430_s2 }
 0x254   :  { %v328_v38 = vpop.permute.xlu1 %327 }
 0x255   :  { %v330_v39 = vadd.f32 %v328_v38, %v320_v37 }
 0x257   :  { %1381 = vtanh.f32 %v330_v39 }
 0x264   :  { %v1382_v40 = vpop.eup %1381 }
 0x265   :  { %333 = vrot.lane.b32.xlu0 %v1382_v40, %s1429_s1 }
 0x2d7   :  { %v334_v41 = vpop.permute.xlu0 %333 }
 0x2d8   :  { %v336_v42 = vmul.f32 %v334_v41, %v319_v34  ;;  %v27_v34 = vld [vmem:[%s1732_s0 + $0x38] sm:$0xff] }
 0x2da   :  { %340 = vrot.lane.b32.xlu1 %v336_v42, %s1430_s2 }
 0x34c   :  { %v341_v43 = vpop.permute.xlu1 %340 }
 0x34d   :  { %1290 = vmatmul.mubr.msk.f32.vlgmr.msra.gmra.mxu1 %vm237_vm8, %v341_v43 }
 0x34e   :  { %1293 = vmatpush3.msra.mxu1 %v1480_v7  ;;  %1300 = vmatprep.mubr.msk.f32.mxu1 %vm1427_vm1, %v1426_v3 }
 0x34f   :  { %1294 = vmatprep.subr.mxu1 %v1426_v3 }
 0x350   :  { %1295 = vmatpush3.msra.mxu1 %v1488_v8 }
 0x351   :  { %1296 = vmatprep.subr.mxu1 %v1426_v3 }
 0x352   :  { %1297 = vmatpush3.msra.mxu1 %v1497_v10 }
 0x353   :  { %1298 = vmatprep.subr.mxu1 %v1426_v3 }
 0x354   :  { %1299 = vmatpush3.msra.mxu1 %v1507_v12 }
 0x355   :  { %1314 = vmatprep.subr.mxu1 %v1426_v3 }
 0x40d   :  { %v410_v44 = vpop.f32.mrf.mxu1 }
 0x40e   :  { %v414_v45 = vadd.f32 %v1260_v23, %v410_v44  ;;  %v24_v23 = vld [vmem:[%s1732_s0 + $0x20] sm:$0xff] }
 0x40f   :  { %v1291_v46 = vpop.f32.mrf.mxu1 }
 0x410   :  { %v1169_v47 = vmul.f32 -1.442695, %v414_v45 }
 0x412   :  { %1383 = vpow2.f32 %v1169_v47 }
 0x41f   :  { %v1384_v48 = vpop.eup %1383 }
 0x420   :  { %v418_v49 = vadd.f32 1.0, %v1384_v48 }
 0x422   :  { %1385 = vrcp.f32 %v418_v49 }
 0x42f   :  { %v1386_v50 = vpop.eup %1385 }
 0x430   :  { %v421_v51 = vmul.f32 %v1386_v50, %v1549_v30 }
 0x432   :  { %v422_v52 = vadd.f32 %v421_v51, %v1552_v32 }
 0x434   :  { %425 = vrot.lane.b32.xlu0 %v422_v52, %s1429_s1  ;;  %v423_v56 = vmul.f32 %v422_v52, %v330_v39 }
 0x4a6   :  { %v426_v53 = vpop.permute.xlu0 %425 }
 0x4a7   :  { %v428_v54 = vmul.f32 %v426_v53, %v422_v52 }
 0x4a9   :  { %430 = vrot.lane.b32.xlu1 %v428_v54, %s1430_s2 }
 0x4ad   :  { %37 = vperm.xlu1 %1376, %v22_v55  }
 0x51b   :  { %v431_v57 = vpop.permute.xlu1 %430 }
 0x51c   :  { %v433_v58 = vadd.f32 %v431_v57, %v423_v56 }
 0x51e   :  { %1387 = vtanh.f32 %v433_v58 }
 0x528   :  { %v38_v59 = vpop.permute.xlu1 %37 }
 0x529   :  { %vm56_vm9 = vcmp.eq.s32.totalorder %v1531_v16, %v38_v59 }
 0x52a   :  { %v1152_v60 = vsel %vm56_vm9, 1.0, %v1426_v3 }
 0x52b   :  { %v1388_v61 = vpop.eup %1387  ;;  %1261 = vmatprep.mubr.msk.f32.mxu0 %vm85_vm2, %v1152_v60 }
 0x52c   :  { %436 = vrot.lane.b32.xlu0 %v1388_v61, %s1429_s1 }
 0x530   :  { %40 = vperm.xlu0 %1375, %v23_v62  }
 0x59e   :  { %v437_v63 = vpop.permute.xlu0 %436 }
 0x59f   :  { %v439_v0 = vmul.f32 %v437_v63, %v422_v52 }
 0x5a1   :  { %443 = vrot.lane.b32.xlu1 %v439_v0, %s1430_s2 }
 0x5ab   :  { %v41_v1 = vpop.permute.xlu0 %40 }
 0x5ac   :  { %vm57_vm10 = vcmp.eq.s32.totalorder %v1531_v16, %v41_v1 }
 0x5ad   :  { %v1153_v2 = vsel %vm57_vm10, 1.0, %v1426_v3 }
 0x5ae   :  { %1262 = vmatmul.mubr.msk.f32.gmra.mxu0 %vm85_vm2, %v1153_v2 }
 0x613   :  { %v444_v4 = vpop.permute.xlu1 %443 }
 0x614   :  { %1301 = vmatmul.mubr.msk.f32.vlgmr.msra.gmra.mxu1 %vm237_vm8, %v444_v4 }
 0x615   :  { %1315 = vmatpush3.msra.mxu1 %v1480_v7  ;;  %1322 = vmatprep.mubr.msk.f32.mxu1 %vm1427_vm1, %v1426_v3 }
 0x616   :  { %1316 = vmatprep.subr.mxu1 %v1426_v3 }
 0x617   :  { %1317 = vmatpush3.msra.mxu1 %v1488_v8 }
 0x618   :  { %1318 = vmatprep.subr.mxu1 %v1426_v3 }
 0x619   :  { %1319 = vmatpush3.msra.mxu1 %v1497_v10 }
 0x61a   :  { %1320 = vmatprep.subr.mxu1 %v1426_v3 }
 0x61b   :  { %1321 = vmatpush3.msra.mxu1 %v1507_v12 }
 0x61c   :  { %1336 = vmatprep.subr.mxu1 %v1426_v3 }
 0x66e   :  { %v1600_v5 = vpop.f32.mrf.mxu0 }
 0x670   :  { %v190_v6 = vpop.f32.mrf.mxu0 }
 0x6d4   :  { %v513_v9 = vpop.f32.mrf.mxu1 }
 0x6d5   :  { %v517_v11 = vadd.f32 %v513_v9, %v190_v6 }
 0x6d6   :  { %v1302_v13 = vpop.f32.mrf.mxu1 }
 0x6d7   :  { %v1171_v14 = vmul.f32 -1.442695, %v517_v11 }
 0x6d9   :  { %1389 = vpow2.f32 %v1171_v14 }
 0x6e6   :  { %v1390_v15 = vpop.eup %1389 }
 0x6e7   :  { %v521_v17 = vadd.f32 1.0, %v1390_v15 }
 0x6e9   :  { %1391 = vrcp.f32 %v521_v17 }
 0x6f6   :  { %v1392_v18 = vpop.eup %1391 }
 0x6f7   :  { %v524_v19 = vmul.f32 %v1392_v18, %v1549_v30 }
 0x6f9   :  { %v525_v20 = vadd.f32 %v524_v19, %v1552_v32 }
 0x6fb   :  { %528 = vrot.lane.b32.xlu0 %v525_v20, %s1429_s1  ;;  %v526_v25 = vmul.f32 %v525_v20, %v433_v58 }
 0x76d   :  { %v529_v21 = vpop.permute.xlu0 %528 }
 0x76e   :  { %v531_v22 = vmul.f32 %v529_v21, %v525_v20 }
 0x770   :  { %533 = vrot.lane.b32.xlu1 %v531_v22, %s1430_s2 }
 0x774   :  { %43 = vperm.xlu1 %1376, %v24_v23  }
 0x778   :  { %49 = vperm.xlu1 %1376, %v26_v24  }
 0x7e2   :  { %v534_v26 = vpop.permute.xlu1 %533 }
 0x7e3   :  { %v536_v27 = vadd.f32 %v534_v26, %v526_v25 }
 0x7e5   :  { %1393 = vtanh.f32 %v536_v27 }
 0x7ef   :  { %v44_v28 = vpop.permute.xlu1 %43 }
 0x7f0   :  { %vm58_vm11 = vcmp.eq.s32.totalorder %v1531_v16, %v44_v28 }
 0x7f1   :  { %v1154_v29 = vsel %vm58_vm11, 1.0, %v1426_v3 }
 0x7f2   :  { %v1394_v31 = vpop.eup %1393  ;;  %1264 = vmatprep.mubr.msk.f32.mxu0 %vm85_vm2, %v1154_v29 }
 0x7f3   :  { %539 = vrot.lane.b32.xlu0 %v1394_v31, %s1429_s1  ;;  %v50_v37 = vpop.permute.xlu1 %49 }
 0x7f4   :  { %vm60_vm12 = vcmp.eq.s32.totalorder %v1531_v16, %v50_v37 }
 0x7f5   :  { %v1156_v40 = vsel %vm60_vm12, 1.0, %v1426_v3 }
 0x7f7   :  { %46 = vperm.xlu0 %1375, %v25_v33  }
 0x7fb   :  { %52 = vperm.xlu0 %1375, %v27_v34  }
 0x865   :  { %v540_v35 = vpop.permute.xlu0 %539 }
 0x866   :  { %v542_v36 = vmul.f32 %v540_v35, %v525_v20 }
 0x868   :  { %546 = vrot.lane.b32.xlu1 %v542_v36, %s1430_s2 }
 0x872   :  { %v47_v38 = vpop.permute.xlu0 %46 }
 0x873   :  { %vm59_vm13 = vcmp.eq.s32.totalorder %v1531_v16, %v47_v38 }
 0x874   :  { %v1155_v39 = vsel %vm59_vm13, 1.0, %v1426_v3 }
 0x875   :  { %1265 = vmatmul.mubr.msk.f32.gmra.mxu0 %vm85_vm2, %v1155_v39 }
 0x876   :  { %1267 = vmatprep.mubr.msk.f32.mxu0 %vm85_vm2, %v1156_v40  ;;  %v53_v41 = vpop.permute.xlu0 %52 }
 0x877   :  { %vm61_vm14 = vcmp.eq.s32.totalorder %v1531_v16, %v53_v41 }
 0x878   :  { %v1157_v42 = vsel %vm61_vm14, 1.0, %v1426_v3 }
 0x879   :  { %1268 = vmatmul.mubr.msk.f32.gmra.mxu0 %vm85_vm2, %v1157_v42 }
 0x87a   :  { %1311 = vmatprep.mubr.msk.f32.mxu0 %vm1427_vm1, %v1426_v3 }
 0x8da   :  { %v547_v43 = vpop.permute.xlu1 %546 }
 0x8db   :  { %1312 = vmatmul.mubr.msk.f32.vlgmr.msra.gmra.mxu0 %vm237_vm8, %v547_v43 }
 0x8dc   :  { %1326 = vmatpush3.msra.mxu0 %v1480_v7  ;;  %1333 = vmatprep.mubr.msk.f32.mxu0 %vm1427_vm1, %v1426_v3 }
 0x8dd   :  { %1327 = vmatprep.subr.mxu0 %v1426_v3 }
 0x8de   :  { %1328 = vmatpush3.msra.mxu0 %v1488_v8 }
 0x8df   :  { %1329 = vmatprep.subr.mxu0 %v1426_v3 }
 0x8e0   :  { %1330 = vmatpush3.msra.mxu0 %v1497_v10 }
 0x8e1   :  { %1331 = vmatprep.subr.mxu0 %v1426_v3 }
 0x8e2   :  { %1332 = vmatpush3.msra.mxu0 %v1507_v12 }
 0x8e3   :  { %1347 = vmatprep.subr.mxu0 %v1426_v3 }
 0x935   :  { %v1645_v16 = vpop.f32.mrf.mxu0 }
 0x937   :  { %v200_v44 = vpop.f32.mrf.mxu0 }
 0x939   :  { %v1647_v45 = vpop.f32.mrf.mxu0 }
 0x93b   :  { %v1649_v46 = vpop.f32.mrf.mxu0 }
 0x99b   :  { %v616_v47 = vpop.f32.mrf.mxu0 }
 0x99c   :  { %v620_v48 = vadd.f32 %v1600_v5, %v616_v47 }
 0x99d   :  { %v1313_v49 = vpop.f32.mrf.mxu0 }
 0x99e   :  { %v1173_v50 = vmul.f32 -1.442695, %v620_v48 }
 0x9a0   :  { %1395 = vpow2.f32 %v1173_v50 }
 0x9ad   :  { %v1396_v51 = vpop.eup %1395 }
 0x9ae   :  { %v624_v52 = vadd.f32 1.0, %v1396_v51 }
 0x9b0   :  { %1397 = vrcp.f32 %v624_v52 }
 0x9bd   :  { %v1398_v53 = vpop.eup %1397 }
 0x9be   :  { %v627_v54 = vmul.f32 %v1398_v53, %v1549_v30 }
 0x9c0   :  { %v628_v55 = vadd.f32 %v627_v54, %v1552_v32 }
 0x9c2   :  { %631 = vrot.lane.b32.xlu0 %v628_v55, %s1429_s1  ;;  %v629_v58 = vmul.f32 %v628_v55, %v536_v27 }
 0xa34   :  { %v632_v56 = vpop.permute.xlu0 %631 }
 0xa35   :  { %v634_v57 = vmul.f32 %v632_v56, %v628_v55 }
 0xa37   :  { %636 = vrot.lane.b32.xlu1 %v634_v57, %s1430_s2 }
 0xaa9   :  { %v637_v59 = vpop.permute.xlu1 %636 }
 0xaaa   :  { %v639_v60 = vadd.f32 %v637_v59, %v629_v58 }
 0xaac   :  { %1399 = vtanh.f32 %v639_v60 }
 0xab9   :  { %v1400_v61 = vpop.eup %1399 }
 0xaba   :  { %642 = vrot.lane.b32.xlu0 %v1400_v61, %s1429_s1 }
 0xb2c   :  { %v643_v62 = vpop.permute.xlu0 %642 }
 0xb2d   :  { %v645_v63 = vmul.f32 %v643_v62, %v628_v55 }
 0xb2f   :  { %649 = vrot.lane.b32.xlu1 %v645_v63, %s1430_s2 }
 0xba1   :  { %v650_v0 = vpop.permute.xlu1 %649 }
 0xba2   :  { %1323 = vmatmul.mubr.msk.f32.vlgmr.msra.gmra.mxu1 %vm237_vm8, %v650_v0 }
 0xba3   :  { %1337 = vmatpush3.msra.mxu1 %v1480_v7  ;;  %1344 = vmatprep.mubr.msk.f32.mxu1 %vm1427_vm1, %v1426_v3 }
 0xba4   :  { %1338 = vmatprep.subr.mxu1 %v1426_v3 }
 0xba5   :  { %1339 = vmatpush3.msra.mxu1 %v1488_v8 }
 0xba6   :  { %1340 = vmatprep.subr.mxu1 %v1426_v3 }
 0xba7   :  { %1341 = vmatpush3.msra.mxu1 %v1497_v10 }
 0xba8   :  { %1342 = vmatprep.subr.mxu1 %v1426_v3 }
 0xba9   :  { %1343 = vmatpush3.msra.mxu1 %v1507_v12 }
 0xbaa   :  { %1358 = vmatprep.subr.mxu1 %v1426_v3 }
 0xc62   :  { %v719_v1 = vpop.f32.mrf.mxu1 }
 0xc63   :  { %v723_v2 = vadd.f32 %v719_v1, %v200_v44 }
 0xc64   :  { %v1324_v4 = vpop.f32.mrf.mxu1 }
 0xc65   :  { %v1175_v5 = vmul.f32 -1.442695, %v723_v2 }
 0xc67   :  { %1401 = vpow2.f32 %v1175_v5 }
 0xc74   :  { %v1402_v6 = vpop.eup %1401 }
 0xc75   :  { %v727_v9 = vadd.f32 1.0, %v1402_v6 }
 0xc77   :  { %1403 = vrcp.f32 %v727_v9 }
 0xc84   :  { %v1404_v11 = vpop.eup %1403 }
 0xc85   :  { %v730_v13 = vmul.f32 %v1404_v11, %v1549_v30 }
 0xc87   :  { %v731_v14 = vadd.f32 %v730_v13, %v1552_v32  ;;  %v1061_v13 = vld [vmem:[%s1735_s3 + $0x18] sm:$0xff] }
 0xc89   :  { %734 = vrot.lane.b32.xlu0 %v731_v14, %s1429_s1  ;;  %v732_v18 = vmul.f32 %v731_v14, %v639_v60 }
 0xcfb   :  { %v735_v15 = vpop.permute.xlu0 %734 }
 0xcfc   :  { %v737_v17 = vmul.f32 %v735_v15, %v731_v14 }
 0xcfe   :  { %739 = vrot.lane.b32.xlu1 %v737_v17, %s1430_s2 }
 0xd70   :  { %v740_v19 = vpop.permute.xlu1 %739 }
 0xd71   :  { %v742_v20 = vadd.f32 %v740_v19, %v732_v18 }
 0xd73   :  { %1405 = vtanh.f32 %v742_v20 }
 0xd80   :  { %v1406_v21 = vpop.eup %1405 }
 0xd81   :  { %745 = vrot.lane.b32.xlu0 %v1406_v21, %s1429_s1 }
 0xdf3   :  { %v746_v22 = vpop.permute.xlu0 %745 }
 0xdf4   :  { %v748_v23 = vmul.f32 %v746_v22, %v731_v14  ;;  %v1058_v14 = vld [vmem:[%s1735_s3] sm:$0xff] }
 0xdf6   :  { %752 = vrot.lane.b32.xlu1 %v748_v23, %s1430_s2 }
 0xe68   :  { %v753_v24 = vpop.permute.xlu1 %752 }
 0xe69   :  { %1334 = vmatmul.mubr.msk.f32.vlgmr.msra.gmra.mxu0 %vm237_vm8, %v753_v24 }
 0xe6a   :  { %1348 = vmatpush3.msra.mxu0 %v1480_v7  ;;  %1355 = vmatprep.mubr.msk.f32.mxu0 %vm1427_vm1, %v1426_v3 }
 0xe6b   :  { %1349 = vmatprep.subr.mxu0 %v1426_v3 }
 0xe6c   :  { %1350 = vmatpush3.msra.mxu0 %v1488_v8 }
 0xe6d   :  { %1351 = vmatprep.subr.mxu0 %v1426_v3 }
 0xe6e   :  { %1352 = vmatpush3.msra.mxu0 %v1497_v10 }
 0xe6f   :  { %1353 = vmatprep.subr.mxu0 %v1426_v3 }
 0xe70   :  { %1354 = vmatpush3.msra.mxu0 %v1507_v12 }
 0xf29   :  { %v822_v25 = vpop.f32.mrf.mxu0 }
 0xf2a   :  { %v826_v26 = vadd.f32 %v1645_v16, %v822_v25 }
 0xf2b   :  { %v1335_v27 = vpop.f32.mrf.mxu0 }
 0xf2c   :  { %v1177_v7 = vmul.f32 -1.442695, %v826_v26 }
 0xf2e   :  { %1407 = vpow2.f32 %v1177_v7 }
 0xf3b   :  { %v1408_v28 = vpop.eup %1407 }
 0xf3c   :  { %v830_v29 = vadd.f32 1.0, %v1408_v28 }
 0xf3e   :  { %1409 = vrcp.f32 %v830_v29 }
 0xf4b   :  { %v1410_v31 = vpop.eup %1409 }
 0xf4c   :  { %v833_v8 = vmul.f32 %v1410_v31, %v1549_v30 }
 0xf4e   :  { %v834_v33 = vadd.f32 %v833_v8, %v1552_v32 }
 0xf50   :  { %837 = vrot.lane.b32.xlu0 %v834_v33, %s1429_s1  ;;  %v835_v12 = vmul.f32 %v834_v33, %v742_v20  ;;  %v1182_v20 = vld [vmem:[%s1736_s4] ss:$0 sm:$0xff] }
 0xfc2   :  { %v838_v10 = vpop.permute.xlu0 %837 }
 0xfc3   :  { %v840_v34 = vmul.f32 %v838_v10, %v834_v33 }
 0xfc5   :  { %842 = vrot.lane.b32.xlu1 %v840_v34, %s1430_s2 }
0x1037   :  { %v843_v35 = vpop.permute.xlu1 %842 }
0x1038   :  { %v845_v36 = vadd.f32 %v843_v35, %v835_v12 }
0x103a   :  { %1411 = vtanh.f32 %v845_v36 }
0x1047   :  { %v1412_v37 = vpop.eup %1411 }
0x1048   :  { %848 = vrot.lane.b32.xlu0 %v1412_v37, %s1429_s1 }
0x10ba   :  { %v849_v38 = vpop.permute.xlu0 %848 }
0x10bb   :  { %v851_v39 = vmul.f32 %v849_v38, %v834_v33 }
0x10bd   :  { %855 = vrot.lane.b32.xlu1 %v851_v39, %s1430_s2 }
0x112f   :  { %v856_v40 = vpop.permute.xlu1 %855 }
0x1130   :  { %1345 = vmatmul.mubr.msk.f32.vlgmr.msra.gmra.mxu1 %vm237_vm8, %v856_v40 }
0x1131   :  { %1366 = vmatprep.mubr.msk.f32.mxu1 %vm1427_vm1, %v1426_v3  ;;  %1359 = vmatpush3.msra.mxu1 %v1061_v13 }
0x1132   :  { %1360 = vmatprep.subr.mxu1 %v1426_v3 }
0x11f0   :  { %v925_v41 = vpop.f32.mrf.mxu1 }
0x11f1   :  { %v929_v42 = vadd.f32 %v925_v41, %v1649_v46 }
0x11f2   :  { %v1346_v43 = vpop.f32.mrf.mxu1 }
0x11f3   :  { %v1179_v16 = vmul.f32 -1.442695, %v929_v42 }
0x11f5   :  { %1413 = vpow2.f32 %v1179_v16 }
0x1202   :  { %v1414_v44 = vpop.eup %1413 }
0x1203   :  { %v933_v47 = vadd.f32 1.0, %v1414_v44 }
0x1205   :  { %1415 = vrcp.f32 %v933_v47 }
0x1212   :  { %v1416_v48 = vpop.eup %1415 }
0x1213   :  { %v936_v49 = vmul.f32 %v1416_v48, %v1549_v30 }
0x1215   :  { %v937_v50 = vadd.f32 %v936_v49, %v1552_v32 }
0x1217   :  { %940 = vrot.lane.b32.xlu0 %v937_v50, %s1429_s1  ;;  %v938_v53 = vmul.f32 %v937_v50, %v845_v36 }
0x1289   :  { %v941_v51 = vpop.permute.xlu0 %940 }
0x128a   :  { %v943_v52 = vmul.f32 %v941_v51, %v937_v50 }
0x128c   :  { %945 = vrot.lane.b32.xlu1 %v943_v52, %s1430_s2 }
0x12fe   :  { %v946_v54 = vpop.permute.xlu1 %945 }
0x12ff   :  { %v948_v46 = vadd.f32 %v946_v54, %v938_v53 }
0x1301   :  { %1417 = vtanh.f32 %v948_v46 }
0x130e   :  { %v1418_v55 = vpop.eup %1417 }
0x130f   :  { %951 = vrot.lane.b32.xlu0 %v1418_v55, %s1429_s1 }
0x1381   :  { %v952_v56 = vpop.permute.xlu0 %951 }
0x1382   :  { %v954_v57 = vmul.f32 %v952_v56, %v937_v50 }
0x1384   :  { %958 = vrot.lane.b32.xlu1 %v954_v57, %s1430_s2 }
0x13f6   :  { %v959_v58 = vpop.permute.xlu1 %958 }
0x13f7   :  { %1356 = vmatmul.mubr.msk.f32.vlgmr.msra.gmra.mxu0 %vm237_vm8, %v959_v58 }
0x14b7   :  { %v1028_v59 = vpop.f32.mrf.mxu0 }
0x14b8   :  { %v1032_v60 = vadd.f32 %v1647_v45, %v1028_v59 }
0x14b9   :  { %v1357_v61 = vpop.f32.mrf.mxu0 }
0x14ba   :  { %v1181_v62 = vmul.f32 -1.442695, %v1032_v60 }
0x14bc   :  { %1419 = vpow2.f32 %v1181_v62 }
0x14c9   :  { %v1420_v63 = vpop.eup %1419 }
0x14ca   :  { %v1036_v0 = vadd.f32 1.0, %v1420_v63 }
0x14cc   :  { %1421 = vrcp.f32 %v1036_v0 }
0x14d9   :  { %v1422_v1 = vpop.eup %1421 }
0x14da   :  { %v1039_v2 = vmul.f32 %v1422_v1, %v1549_v30  ;;  %v1060_v30 = vld [vmem:[%s1735_s3 + $0x10] sm:$0xff] }
0x14db   :  { %1361 = vmatpush3.msra.mxu1 %v1060_v30 }
0x14dc   :  { %v1040_v4 = vadd.f32 %v1039_v2, %v1552_v32  ;;  %v1059_v32 = vld [vmem:[%s1735_s3 + $0x8] sm:$0xff]  ;;  %1362 = vmatprep.subr.mxu1 %v1426_v3 }
0x14dd   :  { %1363 = vmatpush3.msra.mxu1 %v1059_v32 }
0x14de   :  { %1043 = vrot.lane.b32.xlu0 %v1040_v4, %s1429_s1  ;;  %v1041_v9 = vmul.f32 %v1040_v4, %v948_v46  ;;  %1364 = vmatprep.subr.mxu1 %v1426_v3 }
0x14df   :  { %1365 = vmatpush3.msra.mxu1 %v1058_v14 }
0x1550   :  { %v1044_v5 = vpop.permute.xlu0 %1043 }
0x1551   :  { %v1046_v6 = vmul.f32 %v1044_v5, %v1040_v4 }
0x1553   :  { %1048 = vrot.lane.b32.xlu1 %v1046_v6, %s1430_s2 }
0x15c5   :  { %v1049_v11 = vpop.permute.xlu1 %1048 }
0x15c6   :  { %v1051_v45 = vadd.f32 %v1049_v11, %v1041_v9 }
0x15c8   :  { %1423 = vtanh.f32 %v1051_v45 }
0x15d5   :  { %v1424_v15 = vpop.eup %1423 }
0x15d6   :  { %1054 = vrot.lane.b32.xlu0 %v1424_v15, %s1429_s1 }
0x1648   :  { %v1055_v17 = vpop.permute.xlu0 %1054 }
0x1649   :  { %v1057_v18 = vmul.f32 %v1055_v17, %v1040_v4 }
0x164b   :  { %1070 = vrot.lane.b32.xlu1 %v1057_v18, %s1430_s2 }
0x16bd   :  { %v1071_v19 = vpop.permute.xlu1 %1070 }
0x16be   :  { %1367 = vmatmul.mubr.msk.f32.vlgmr.msra.gmra.mxu1 %vm237_vm8, %v1071_v19 }
0x177e   :  { %v1140_v21 = vpop.f32.mrf.mxu1 }
0x177f   :  { %v1141_v22 = vadd.f32 %v1182_v20, %v1140_v21 }
0x1780   :  { %v1368_v23 = vpop.f32.mrf.mxu1 }
0x1781   :  { %1145 = vst.msk [vmem:[%s1737_s5] sm:$0xff] %vm1144_vm15, %v1141_v22 }

</bundles_post_ra>
